<compile_context>
chip_gen: v7x
topology: tpu7x:2x2x1
jax: 0.10.0
libtpu: 0.0.40
codegen_flags: <defaults>
</compile_context>

<pallas_src>
import functools

import jax
import jax.numpy as jnp
from jax.experimental import pallas as pl
from jax.experimental.pallas import tpu as pltpu


def _round_up(x, m):
    return (x + m - 1) // m * m


def gru_decoder_kernel(x_ref, h0_ref, wi_ref, wh_ref, b_ref, wdec_ref, bdec_ref,
                       out_ref, hnew_ref, h_scratch):
    t = pl.program_id(0)

    @pl.when(t == 0)
    def _init():
        h_scratch[...] = h0_ref[...]

    H = h_scratch.shape[1]
    mxu_dtype = wi_ref.dtype

    x = x_ref[0]              # (B, I)  float32
    h = h_scratch[...]        # (B, H)  float32

    # Fused gate pre-activations: one 4H-lane slab, two MXU pushes.
    # Lane layout of g: [ r | z | i_n | h_n ].
    g = (jnp.dot(x.astype(mxu_dtype), wi_ref[...],
                 preferred_element_type=jnp.float32)
         + jnp.dot(h.astype(mxu_dtype), wh_ref[...],
                   preferred_element_type=jnp.float32)
         + b_ref[...])        # (B, 4H) f32, packed bias added once

    r = jax.nn.sigmoid(g[:, 0:H])
    z = jax.nn.sigmoid(g[:, H:2 * H])
    n = jnp.tanh(g[:, 2 * H:3 * H] + r * g[:, 3 * H:4 * H])
    h_new = (1.0 - z) * n + z * h          # (B, H) f32
    h_scratch[...] = h_new

    # Decoder: Linear(H -> O_pad), lane-dense padded output width.
    out = jnp.dot(h_new.astype(mxu_dtype), wdec_ref[...],
                  preferred_element_type=jnp.float32)
    out_ref[0] = (out + bdec_ref[...]).astype(out_ref.dtype)

    @pl.when(t == pl.num_programs(0) - 1)
    def _final():
        hnew_ref[...] = h_new.astype(hnew_ref.dtype)


@functools.partial(jax.jit, static_argnames=("output_size",))
def gru_rollout(x_seq, hidden, params, output_size):
    """Run T GRU steps + decoder inside a single pallas_call.

    x_seq:  (T, B, input_size) float32
    hidden: (1, B, hidden_size) float32
    returns (out_seq (T, B, output_size), hidden' (1, B, hidden_size))
    """
    T, B, I = x_seq.shape
    H = hidden.shape[-1]
    O_pad = params["wdec"].shape[1]

    # Pad batch to a full f32 sublane group.
    B_pad = _round_up(B, 8)
    h0 = hidden[0]
    if B_pad != B:
        x_seq = jnp.pad(x_seq, ((0, 0), (0, B_pad - B), (0, 0)))
        h0 = jnp.pad(h0, ((0, B_pad - B), (0, 0)))

    out_seq, h_new = pl.pallas_call(
        gru_decoder_kernel,
        out_shape=(
            jax.ShapeDtypeStruct((T, B_pad, O_pad), jnp.float32),
            jax.ShapeDtypeStruct((B_pad, H), jnp.float32),
        ),
        grid=(T,),
        in_specs=[
            pl.BlockSpec((1, B_pad, I), lambda t: (t, 0, 0)),   # x_t (streamed)
            pl.BlockSpec((B_pad, H), lambda t: (0, 0)),         # h0 (fetched once)
            pl.BlockSpec((I, 4 * H), lambda t: (0, 0)),         # Wi_all (resident)
            pl.BlockSpec((H, 4 * H), lambda t: (0, 0)),         # Wh_all (resident)
            pl.BlockSpec((1, 4 * H), lambda t: (0, 0)),         # packed bias
            pl.BlockSpec((H, O_pad), lambda t: (0, 0)),         # Wdec (padded)
            pl.BlockSpec((1, O_pad), lambda t: (0, 0)),         # bdec (padded)
        ],
        out_specs=(
            pl.BlockSpec((1, B_pad, O_pad), lambda t: (t, 0, 0)),
            pl.BlockSpec((B_pad, H), lambda t: (0, 0)),
        ),
        scratch_shapes=[pltpu.VMEM((B_pad, H), jnp.float32)],   # recurrent h
        input_output_aliases={1: 1},   # hidden in -> hidden out (reuse HBM buffer)
        compiler_params=pltpu.CompilerParams(
            dimension_semantics=("arbitrary",)),                # h carries over T
    )(x_seq, h0, params["wi"], params["wh"], params["b"],
      params["wdec"], params["bdec"])

    return out_seq[:, :B, :output_size], h_new[:B].reshape(1, B, H)


def rnn_forward(x, hidden, params, output_size):
    """Single-step forward matching RNN.forward: x (B, I), hidden (1, B, H)."""
    out_seq, h_new = gru_rollout(x[None].astype(jnp.float32), hidden, params,
                                 output_size)
    return out_seq[0], h_new


def init_params(key, input_size, hidden_size, output_size,
                mxu_dtype=jnp.bfloat16):
    """PyTorch-style U(-1/sqrt(H), 1/sqrt(H)) init, packed for the fused kernel."""
    ks = jax.random.split(key, 14)
    H = hidden_size
    bound = 1.0 / float(hidden_size) ** 0.5

    def u(k, shape):
        return jax.random.uniform(k, shape, jnp.float32, -bound, bound)

    # Per-gate weights stored transposed: (in_features, out_features).
    wir, wiz, win = (u(ks[0], (input_size, H)), u(ks[1], (input_size, H)),
                     u(ks[2], (input_size, H)))
    whr, whz, whn = u(ks[3], (H, H)), u(ks[4], (H, H)), u(ks[5], (H, H))
    b_ir, b_iz, b_in = u(ks[6], (1, H)), u(ks[7], (1, H)), u(ks[8], (1, H))
    b_hr, b_hz, b_hn = u(ks[9], (1, H)), u(ks[10], (1, H)), u(ks[11], (1, H))

    # Fused gate layout along 4H lanes: [ r | z | i_n | h_n ].
    wi_all = jnp.concatenate(
        [wir, wiz, win, jnp.zeros((input_size, H), jnp.float32)], axis=1)
    wh_all = jnp.concatenate(
        [whr, whz, jnp.zeros((H, H), jnp.float32), whn], axis=1)
    # b_ir+b_hr and b_iz+b_hz fold; b_in / b_hn stay split (b_hn sits inside r*(...)).
    b_all = jnp.concatenate([b_ir + b_hr, b_iz + b_hz, b_in, b_hn], axis=1)

    # Decoder padded to a lane-dense (multiple of 128) output width.
    O_pad = _round_up(output_size, 128)
    wdec = u(ks[12], (H, output_size))
    bdec = u(ks[13], (1, output_size))
    wdec_pad = jnp.zeros((H, O_pad), jnp.float32).at[:, :output_size].set(wdec)
    bdec_pad = jnp.zeros((1, O_pad), jnp.float32).at[:, :output_size].set(bdec)

    return {
        "wi": wi_all.astype(mxu_dtype),   # MXU operands in bf16
        "wh": wh_all.astype(mxu_dtype),
        "b": b_all,                       # f32, added post-accumulation
        "wdec": wdec_pad.astype(mxu_dtype),
        "bdec": bdec_pad,                 # f32
    }


if __name__ == "__main__":
    input_size, hidden_size, output_size, n_layers = 16, 32, 8, 1
    batch, seq_len = 2, 8

    key = jax.random.PRNGKey(0)
    k_params, k_x, k_seq = jax.random.split(key, 3)

    params = init_params(k_params, input_size, hidden_size, output_size)

    # Single-step forward (matches RNN.forward semantics).
    x = jax.random.normal(k_x, (batch, input_size), jnp.float32)
    hidden = jnp.zeros((n_layers, batch, hidden_size), jnp.float32)  # init_hidden
    out, new_hidden = rnn_forward(x, hidden, params, output_size)
    jax.block_until_ready((out, new_hidden))
    assert out.shape == (batch, output_size)
    assert new_hidden.shape == (n_layers, batch, hidden_size)

    # Multi-step decode: whole time loop fused inside one pallas_call,
    # hidden state and weights stay resident in VMEM across steps.
    x_seq = jax.random.normal(k_seq, (seq_len, batch, input_size), jnp.float32)
    out_seq, final_hidden = gru_rollout(x_seq, hidden, params, output_size)
    jax.block_until_ready((out_seq, final_hidden))
    assert out_seq.shape == (seq_len, batch, output_size)
    assert final_hidden.shape == (n_layers, batch, hidden_size)

    print("KERNEL_OK")
</pallas_src>

<mosaic_0001>
module attributes {stable_mosaic.version = 11 : i64} {
  func.func @gru_decoder_kernel(%arg0: i32, %arg1: memref<1x8x16xf32, #tpu.memory_space<vmem>>, %arg2: memref<8x32xf32, #tpu.memory_space<vmem>>, %arg3: memref<16x128xbf16, #tpu.memory_space<vmem>>, %arg4: memref<32x128xbf16, #tpu.memory_space<vmem>>, %arg5: memref<1x128xf32, #tpu.memory_space<vmem>>, %arg6: memref<32x128xbf16, #tpu.memory_space<vmem>>, %arg7: memref<1x128xf32, #tpu.memory_space<vmem>>, %arg8: memref<1x8x128xf32, #tpu.memory_space<vmem>>, %arg9: memref<8x32xf32, #tpu.memory_space<vmem>>, %arg10: memref<8x32xf32, #tpu.memory_space<vmem>>) attributes {dimension_semantics = [#tpu.dimension_semantics<arbitrary>], iteration_bounds = array<i64: 1>, scalar_prefetch = 0 : i64, scratch_operands = 1 : i64, tpu.core_type = #tpu.core_type<tc>, window_params = [{transform_indices = @transform_0, window_bounds = array<i64: 1, 8, 16>}, {pipeline_mode = #tpu.pipeline_mode<synchronous>, transform_indices = @transform_1, window_bounds = array<i64: 8, 32>}, {pipeline_mode = #tpu.pipeline_mode<synchronous>, transform_indices = @transform_2, window_bounds = array<i64: 16, 128>}, {pipeline_mode = #tpu.pipeline_mode<synchronous>, transform_indices = @transform_3, window_bounds = array<i64: 32, 128>}, {pipeline_mode = #tpu.pipeline_mode<synchronous>, transform_indices = @transform_4, window_bounds = array<i64: 1, 128>}, {pipeline_mode = #tpu.pipeline_mode<synchronous>, transform_indices = @transform_5, window_bounds = array<i64: 32, 128>}, {pipeline_mode = #tpu.pipeline_mode<synchronous>, transform_indices = @transform_6, window_bounds = array<i64: 1, 128>}, {transform_indices = @transform_7, window_bounds = array<i64: 1, 8, 128>}, {pipeline_mode = #tpu.pipeline_mode<synchronous>, transform_indices = @transform_8, window_bounds = array<i64: 8, 32>}]} {
    %c0_i32 = arith.constant 0 : i32
    %0 = arith.cmpi eq, %arg0, %c0_i32 : i32
    %1 = arith.extui %0 : i1 to i32
    %c0_i32_0 = arith.constant 0 : i32
    %2 = arith.cmpi ne, %1, %c0_i32_0 : i32
    scf.if %2 {
      %c0_27 = arith.constant 0 : index
      %c0_28 = arith.constant 0 : index
      %51 = vector.load %arg2[%c0_27, %c0_28] : memref<8x32xf32, #tpu.memory_space<vmem>>, vector<8x32xf32>
      %c0_29 = arith.constant 0 : index
      %c0_30 = arith.constant 0 : index
      %52 = vector.load %arg10[%c0_29, %c0_30] : memref<8x32xf32, #tpu.memory_space<vmem>>, vector<8x32xf32>
      tpu.vector_store %arg10[%c0_29, %c0_30], %51 {strides = array<i32>} : memref<8x32xf32, #tpu.memory_space<vmem>>, vector<8x32xf32>,
    } else {
    }
    %c0 = arith.constant 0 : index
    %c0_1 = arith.constant 0 : index
    %c0_2 = arith.constant 0 : index
    %3 = vector.load %arg1[%c0, %c0_1, %c0_2] : memref<1x8x16xf32, #tpu.memory_space<vmem>>, vector<1x8x16xf32>
    %4 = vector.shape_cast %3 : vector<1x8x16xf32> to vector<8x16xf32>
    %c0_3 = arith.constant 0 : index
    %c0_4 = arith.constant 0 : index
    %5 = vector.load %arg10[%c0_3, %c0_4] : memref<8x32xf32, #tpu.memory_space<vmem>>, vector<8x32xf32>
    %6 = arith.truncf %4 : vector<8x16xf32> to vector<8x16xbf16>
    %c0_5 = arith.constant 0 : index
    %c0_6 = arith.constant 0 : index
    %7 = vector.load %arg3[%c0_5, %c0_6] : memref<16x128xbf16, #tpu.memory_space<vmem>>, vector<16x128xbf16>
    %cst = arith.constant dense<0.000000e+00> : vector<8x128xf32>
    %8 = tpu.matmul %6, %7, %cst {dimension_numbers = #tpu.dot_dimension_numbers<[1], [0], [0], [1], [0, 0, 1, 1], [], []>} : vector<8x16xbf16>, vector<16x128xbf16>, vector<8x128xf32> -> vector<8x128xf32>
    %9 = arith.truncf %5 : vector<8x32xf32> to vector<8x32xbf16>
    %c0_7 = arith.constant 0 : index
    %c0_8 = arith.constant 0 : index
    %10 = vector.load %arg4[%c0_7, %c0_8] : memref<32x128xbf16, #tpu.memory_space<vmem>>, vector<32x128xbf16>
    %cst_9 = arith.constant dense<0.000000e+00> : vector<8x128xf32>
    %11 = tpu.matmul %9, %10, %cst_9 {dimension_numbers = #tpu.dot_dimension_numbers<[1], [0], [0], [1], [0, 0, 1, 1], [], []>} : vector<8x32xbf16>, vector<32x128xbf16>, vector<8x128xf32> -> vector<8x128xf32>
    %12 = arith.addf %8, %11 : vector<8x128xf32>
    %c0_10 = arith.constant 0 : index
    %c0_11 = arith.constant 0 : index
    %13 = vector.load %arg5[%c0_10, %c0_11] : memref<1x128xf32, #tpu.memory_space<vmem>>, vector<1x128xf32>
    %14 = vector.broadcast %13 : vector<1x128xf32> to vector<8x128xf32>
    %15 = arith.addf %12, %14 : vector<8x128xf32>
    %16 = vector.extract_strided_slice %15 {offsets = [0, 0], sizes = [8, 32], strides = [1, 1]} : vector<8x128xf32> to vector<8x32xf32>
    %17 = arith.negf %16 : vector<8x32xf32>
    %18 = math.exp %17 : vector<8x32xf32>
    %cst_12 = arith.constant 1.000000e+00 : f32
    %19 = vector.broadcast %cst_12 : f32 to vector<8x32xf32>
    %20 = arith.addf %19, %18 : vector<8x32xf32>
    %21 = arith.divf %19, %20 : vector<8x32xf32>
    %22 = vector.extract_strided_slice %15 {offsets = [0, 32], sizes = [8, 32], strides = [1, 1]} : vector<8x128xf32> to vector<8x32xf32>
    %23 = arith.negf %22 : vector<8x32xf32>
    %24 = math.exp %23 : vector<8x32xf32>
    %cst_13 = arith.constant 1.000000e+00 : f32
    %25 = vector.broadcast %cst_13 : f32 to vector<8x32xf32>
    %26 = arith.addf %25, %24 : vector<8x32xf32>
    %27 = arith.divf %25, %26 : vector<8x32xf32>
    %28 = vector.extract_strided_slice %15 {offsets = [0, 64], sizes = [8, 32], strides = [1, 1]} : vector<8x128xf32> to vector<8x32xf32>
    %29 = vector.extract_strided_slice %15 {offsets = [0, 96], sizes = [8, 32], strides = [1, 1]} : vector<8x128xf32> to vector<8x32xf32>
    %30 = arith.mulf %21, %29 : vector<8x32xf32>
    %31 = arith.addf %28, %30 : vector<8x32xf32>
    %32 = math.tanh %31 : vector<8x32xf32>
    %cst_14 = arith.constant 1.000000e+00 : f32
    %33 = vector.broadcast %cst_14 : f32 to vector<8x32xf32>
    %34 = arith.subf %33, %27 : vector<8x32xf32>
    %35 = arith.mulf %34, %32 : vector<8x32xf32>
    %36 = arith.mulf %27, %5 : vector<8x32xf32>
    %37 = arith.addf %35, %36 : vector<8x32xf32>
    %c0_15 = arith.constant 0 : index
    %c0_16 = arith.constant 0 : index
    %38 = vector.load %arg10[%c0_15, %c0_16] : memref<8x32xf32, #tpu.memory_space<vmem>>, vector<8x32xf32>
    tpu.vector_store %arg10[%c0_15, %c0_16], %37 {strides = array<i32>} : memref<8x32xf32, #tpu.memory_space<vmem>>, vector<8x32xf32>,
    %39 = arith.truncf %37 : vector<8x32xf32> to vector<8x32xbf16>
    %c0_17 = arith.constant 0 : index
    %c0_18 = arith.constant 0 : index
    %40 = vector.load %arg6[%c0_17, %c0_18] : memref<32x128xbf16, #tpu.memory_space<vmem>>, vector<32x128xbf16>
    %cst_19 = arith.constant dense<0.000000e+00> : vector<8x128xf32>
    %41 = tpu.matmul %39, %40, %cst_19 {dimension_numbers = #tpu.dot_dimension_numbers<[1], [0], [0], [1], [0, 0, 1, 1], [], []>} : vector<8x32xbf16>, vector<32x128xbf16>, vector<8x128xf32> -> vector<8x128xf32>
    %c0_20 = arith.constant 0 : index
    %c0_21 = arith.constant 0 : index
    %42 = vector.load %arg7[%c0_20, %c0_21] : memref<1x128xf32, #tpu.memory_space<vmem>>, vector<1x128xf32>
    %43 = vector.broadcast %42 : vector<1x128xf32> to vector<8x128xf32>
    %44 = arith.addf %41, %43 : vector<8x128xf32>
    %c0_22 = arith.constant 0 : index
    %c0_23 = arith.constant 0 : index
    %c0_24 = arith.constant 0 : index
    %45 = vector.load %arg8[%c0_22, %c0_23, %c0_24] : memref<1x8x128xf32, #tpu.memory_space<vmem>>, vector<1x8x128xf32>
    %46 = vector.shape_cast %45 : vector<1x8x128xf32> to vector<8x128xf32>
    %47 = vector.shape_cast %44 : vector<8x128xf32> to vector<1x8x128xf32>
    tpu.vector_store %arg8[%c0_22, %c0_23, %c0_24], %47 {strides = array<i32>} : memref<1x8x128xf32, #tpu.memory_space<vmem>>, vector<1x8x128xf32>,
    %c0_i32_25 = arith.constant 0 : i32
    %48 = arith.cmpi eq, %arg0, %c0_i32_25 : i32
    %49 = arith.extui %48 : i1 to i32
    %c0_i32_26 = arith.constant 0 : i32
    %50 = arith.cmpi ne, %49, %c0_i32_26 : i32
    scf.if %50 {
      %c0_27 = arith.constant 0 : index
      %c0_28 = arith.constant 0 : index
      %51 = vector.load %arg9[%c0_27, %c0_28] : memref<8x32xf32, #tpu.memory_space<vmem>>, vector<8x32xf32>
      tpu.vector_store %arg9[%c0_27, %c0_28], %37 {strides = array<i32>} : memref<8x32xf32, #tpu.memory_space<vmem>>, vector<8x32xf32>,
    } else {
    }
    return
  }
  func.func @transform_0(%arg0: i32) -> (i32, i32, i32) {
    %c0_i32 = arith.constant 0 : i32
    %c0_i32_0 = arith.constant 0 : i32
    %c0_i32_1 = arith.constant 0 : i32
    return %arg0, %c0_i32, %c0_i32_0 : i32, i32, i32
  }
  func.func @transform_1(%arg0: i32) -> (i32, i32) {
    %c0_i32 = arith.constant 0 : i32
    %c0_i32_0 = arith.constant 0 : i32
    %c0_i32_1 = arith.constant 0 : i32
    return %c0_i32, %c0_i32_0 : i32, i32
  }
  func.func @transform_2(%arg0: i32) -> (i32, i32) {
    %c0_i32 = arith.constant 0 : i32
    %c0_i32_0 = arith.constant 0 : i32
    %c0_i32_1 = arith.constant 0 : i32
    return %c0_i32, %c0_i32_0 : i32, i32
  }
  func.func @transform_3(%arg0: i32) -> (i32, i32) {
    %c0_i32 = arith.constant 0 : i32
    %c0_i32_0 = arith.constant 0 : i32
    %c0_i32_1 = arith.constant 0 : i32
    return %c0_i32, %c0_i32_0 : i32, i32
  }
  func.func @transform_4(%arg0: i32) -> (i32, i32) {
    %c0_i32 = arith.constant 0 : i32
    %c0_i32_0 = arith.constant 0 : i32
    %c0_i32_1 = arith.constant 0 : i32
    return %c0_i32, %c0_i32_0 : i32, i32
  }
  func.func @transform_5(%arg0: i32) -> (i32, i32) {
    %c0_i32 = arith.constant 0 : i32
    %c0_i32_0 = arith.constant 0 : i32
    %c0_i32_1 = arith.constant 0 : i32
    return %c0_i32, %c0_i32_0 : i32, i32
  }
  func.func @transform_6(%arg0: i32) -> (i32, i32) {
    %c0_i32 = arith.constant 0 : i32
    %c0_i32_0 = arith.constant 0 : i32
    %c0_i32_1 = arith.constant 0 : i32
    return %c0_i32, %c0_i32_0 : i32, i32
  }
  func.func @transform_7(%arg0: i32) -> (i32, i32, i32) {
    %c0_i32 = arith.constant 0 : i32
    %c0_i32_0 = arith.constant 0 : i32
    %c0_i32_1 = arith.constant 0 : i32
    return %arg0, %c0_i32, %c0_i32_0 : i32, i32, i32
  }
  func.func @transform_8(%arg0: i32) -> (i32, i32) {
    %c0_i32 = arith.constant 0 : i32
    %c0_i32_0 = arith.constant 0 : i32
    %c0_i32_1 = arith.constant 0 : i32
    return %c0_i32, %c0_i32_0 : i32, i32
  }
}

</mosaic_0001>

<bundles_post_ra>
// kernel: gru_rollout.1
= control target key start
LH: loop header
LB: loop body
LE: loop exit
PB: predicated region body
PF: predicated region fallthrough
CT: control target
= control target key end

     0   :  { %14 = vsyncpa [#allocation4], 0  ;;  %s521_s0 = inlined_call_operand.vmem [shape: f32[1,8,16], index: 0, kind: input, shape index: {}]   ;;  %s522_s1 = inlined_call_operand.vmem [shape: f32[8,32], index: 1, kind: input, shape index: {}, may-alias: {1,8}]   ;;  %s523_s2 = inlined_call_operand.vmem [shape: bf16[16,128], index: 2, kind: input, shape index: {}]   ;;  %s524_s3 = inlined_call_operand.vmem [shape: bf16[32,128], index: 3, kind: input, shape index: {}]   ;;  %s525_s4 = inlined_call_operand.hbm [shape: f32[1,128], index: 4, kind: input, shape index: {}]   ;;  %s526_s5 = inlined_call_operand.vmem [shape: bf16[32,128], index: 5, kind: input, shape index: {}]   ;;  %s527_s6 = inlined_call_operand.hbm [shape: f32[1,128], index: 6, kind: input, shape index: {}]   ;;  %s528_s7 = inlined_call_operand.vmem [shape: f32[1,8,128], index: 7, kind: output, shape index: {0}]   ;;  %s529_s8 = inlined_call_operand.vmem [shape: f32[8,32], index: 8, kind: output, shape index: {1}, may-alias: {1,8}]  }
   0x1   :  { %15 = vsyncpa [#allocation6], 0  ;;  %s410_s27 = smov [#allocation3]   ;;  %s411_s29 = smov [#allocation5]  }
   0x2   :  { %s30_s28 = sshll.u32 %s410_s27, 4  ;;  %s42_s30 = sshll.u32 %s411_s29, 4  ;;  %s31_s28 = int_to_ptr.vmem [resolvable:$true] %s30_s28  ;;  %s43_s30 = int_to_ptr.vmem [resolvable:$true] %s42_s30 }
   0x3   :  { %s362_s11 = scalar_lea.hbm %s525_s4, 16 }
   0x4   :  { %p363_p0 = scmp.ne.s32.totalorder %s525_s4, %s362_s11  ;;  %p366_p1 = scmp.lt.u32.totalorder %s362_s11, %s525_s4 }
   0x6   :  { %p368_p2 = pnand %p366_p1, %p363_p0 }
   0x8   :  { %371 = shalt.err (!%p368_p2)
}
   0x9   :  { %s372_s16 = scalar_lea.vmem %s31_s28, 16  ;;  %s376_s17 = scalar_lea.vmem %s31_s28, 32 }
   0xa   :  { %p373_p3 = scmp.ne.s32.totalorder %s31_s28, %s372_s16  ;;  %p377_p4 = scmp.lt.s32.totalorder %s31_s28, %s31_s28 }
   0xb   :  { %p378_p5 = scmp.lt.s32.totalorder %s376_s17, %s372_s16 }
   0xd   :  { %p379_p6 = por %p378_p5, %p377_p4 }
   0xf   :  { %p380_p7 = pnand %p379_p6, %p373_p3 }
  0x11   :  { %383 = shalt.err (!%p380_p7)
}
  0x12   :  { %33 = dma.hbm_to_vmem [thread:$0]  %s525_s4, 16, %s31_s28, [#allocation4]  }
  0x13   :  { %s384_s22 = scalar_lea.hbm %s527_s6, 16 }
  0x14   :  { %p385_p8 = scmp.ne.s32.totalorder %s527_s6, %s384_s22  ;;  %p388_p9 = scmp.lt.u32.totalorder %s384_s22, %s527_s6 }
  0x16   :  { %p390_p10 = pnand %p388_p9, %p385_p8 }
  0x18   :  { %393 = shalt.err (!%p390_p10)
}
  0x19   :  { %s394_s27 = scalar_lea.vmem %s43_s30, 16  ;;  %s398_s29 = scalar_lea.vmem %s43_s30, 32 }
  0x1a   :  { %p395_p11 = scmp.ne.s32.totalorder %s43_s30, %s394_s27  ;;  %p399_p12 = scmp.lt.s32.totalorder %s43_s30, %s43_s30 }
  0x1b   :  { %p400_p13 = scmp.lt.s32.totalorder %s398_s29, %s394_s27 }
  0x1d   :  { %p401_p0 = por %p400_p13, %p399_p12 }
  0x1f   :  { %p402_p1 = pnand %p401_p0, %p395_p11 }
  0x21   :  { %405 = shalt.err (!%p402_p1)
}
  0x22   :  { %45 = dma.hbm_to_vmem [thread:$0]  %s527_s6, 16, %s43_s30, [#allocation6]  }
  0x23   :  { %406 = dma.done.wait [#allocation4], 16  }
  0x24   :  { %407 = vsyncadd [#allocation4], 4294967280 }
  0x25   :  { %408 = dma.done.wait [#allocation6], 16  }
  0x26   :  { %409 = vsyncadd [#allocation6], 4294967280  ;;  %v412_v0 = vmov 0.0   ;;  %vm413_vm0 = vmmov 0   ;;  %v351_v1 = vld [vmem:[%s524_s3] sm:$0xff]   ;;  %vm58_vm1 = vcmask 261120  }
  0x27   :  { %322 = vmatprep.subr.bf16.mxu0 %v412_v0  ;;  %330 = vmatprep.subr.bf16.mxu1 %v412_v0  ;;  %v352_v2 = vld [vmem:[%s523_s2] sm:$0xff]   ;;  %v353_v3 = vld [vmem:[%s524_s3 + $0x8] sm:$0xff]   ;;  %vm132_vm2 = vcmask 130048   ;;  %s416_s19 = smov 96  }
  0x28   :  { %332 = vmatprep.mubr.msk.bf16.mxu1 %vm413_vm0, %v412_v0  ;;  %326 = vmatprep.mubr.msk.bf16.mxu0 %vm413_vm0, %v412_v0  ;;  %v60_v4 = vld [vmem:[%s521_s0] sm:$0xff]  ;;  %v308_v14 = vld [vmem:[#allocation3] ss:$0 sm:$0xff]  ;;  %s414_s0 = smov 32   ;;  %v310_v40 = vld [vmem:[#allocation5] ss:$0 sm:$0xff] }
  0x29   :  { %323 = vmatpush3.bf16.msra.mxu0 %v351_v1  ;;  %331 = vmatpush3.bf16.msra.mxu1 %v352_v2  ;;  %v57_v5 = vld [vmem:[%s522_s1] sm:$0xff]  ;;  %v62_v6 = vpack.c.bf16 %v60_v4, %v60_v4  ;;  %s415_s1 = smov 64   ;;  %v355_v30 = vld [vmem:[%s526_s5 + $0x8] sm:$0xff]  }
  0x2a   :  { %324 = vmatprep.subr.bf16.mxu0 %v412_v0  ;;  %59 = vst.msk [vmem:[#allocation2] sm:$0xff] %vm58_vm1, %v57_v5  ;;  %336 = vmatprep.subr.bf16.mxu1 %v412_v0  ;;  %v354_v28 = vld [vmem:[%s526_s5] sm:$0xff]  }
  0x2c   :  { %333 = vmatmul.mubr.msk.bf16.vlgmr.msra.gmra.mrb[0].mxu1 %vm132_vm2, %v62_v6 }
  0x2d   :  { %325 = vmatpush3.bf16.msra.mxu0 %v353_v3  ;;  %340 = vmatprep.mubr.msk.bf16.mxu1 %vm413_vm0, %v412_v0 }
  0x2e   :  { %337 = vmatpush3.bf16.msra.mxu1 %v354_v28 }
  0x2f   :  { %338 = vmatprep.subr.bf16.mxu1 %v412_v0 }
  0x31   :  { %v61_v7 = vld [vmem:[#allocation2] sm:$0xff] }
  0x32   :  { %v65_v8 = vpack.c.bf16 %v61_v7, %v61_v7  ;;  %339 = vmatpush3.bf16.msra.mxu1 %v355_v30 }
  0x34   :  { %327 = vmatmul.mubr.msk.bf16.vlgmr.msra.gmra.mrb[0].mxu0 %vm58_vm1, %v65_v8 }
  0xff   :  { %v170_v9 = vpop.f32.mrb[0].mxu1 }
 0x100   :  { %v334_v10 = vpop.f32.mrb[1].mxu1 }
 0x101   :  { %v173_v11 = vpop.f32.mrb[2].mxu1 }
 0x102   :  { %v335_v12 = vpop.f32.mrb[3].mxu1 }
 0x107   :  { %v120_v13 = vpop.f32.mrb[0].mxu0 }
 0x108   :  { %v171_v15 = vadd.f32 %v170_v9, %v120_v13  ;;  %v328_v16 = vpop.f32.mrb[1].mxu0 }
 0x109   :  { %v123_v17 = vpop.f32.mrb[2].mxu0 }
 0x10a   :  { %v183_v18 = vadd.f32 %v308_v14, %v171_v15  ;;  %v329_v19 = vpop.f32.mrb[3].mxu0 }
 0x10c   :  { %191 = vrot.lane.b32.xlu0 %v183_v18, %s414_s0  ;;  %v309_v20 = vmul.f32 -1.442695, %v183_v18 }
 0x10e   :  { %356 = vpow2.f32 %v309_v20 }
 0x118   :  { %v357_v21 = vpop.eup %356 }
 0x119   :  { %v187_v22 = vadd.f32 1.0, %v357_v21 }
 0x11b   :  { %358 = vrcp.f32 %v187_v22 }
 0x125   :  { %v359_v23 = vpop.eup %358 }
 0x126   :  { %v201_v32 = vsub.f32 1.0, %v359_v23 }
 0x17e   :  { %v192_v24 = vpop.permute.xlu0 %191 }
 0x17f   :  { %v194_v25 = vmul.f32 %v359_v23, %v192_v24 }
 0x181   :  { %196 = vrot.lane.b32.xlu0 %v194_v25, %s415_s1 }
 0x1f3   :  { %v197_v26 = vpop.permute.xlu0 %196 }
 0x1f4   :  { %v199_v27 = vadd.f32 %v197_v26, %v183_v18 }
 0x1f6   :  { %360 = vtanh.f32 %v199_v27 }
 0x200   :  { %v361_v29 = vpop.eup %360 }
 0x201   :  { %203 = vrot.lane.b32.xlu1 %v361_v29, %s416_s19 }
 0x205   :  { %208 = vrot.lane.b32.xlu1 %v61_v7, %s414_s0 }
 0x273   :  { %v204_v31 = vpop.permute.xlu1 %203 }
 0x274   :  { %v206_v34 = vmul.f32 %v204_v31, %v201_v32 }
 0x277   :  { %v209_v33 = vpop.permute.xlu1 %208 }
 0x278   :  { %v211_v35 = vmul.f32 %v359_v23, %v209_v33 }
 0x27a   :  { %v212_v36 = vadd.f32 %v211_v35, %v206_v34 }
 0x27c   :  { %214 = vrot.lane.b32.xlu1 %v212_v36, %s416_s19  ;;  %v218_v37 = vpack.c.bf16 %v212_v36, %v212_v36 }
 0x27e   :  { %231 = vrot.lane.b32.xlu0 %v218_v37, %s416_s19 }
 0x2ee   :  { %v215_v38 = vpop.permute.xlu1 %214 }
 0x2ef   :  { %217 = vst.msk [vmem:[#allocation2] sm:$0xff] %vm58_vm1, %v215_v38  ;;  %292 = vst.msk [vmem:[%s529_s8] sm:$0xff] %vm58_vm1, %v215_v38 }
 0x2f0   :  { %v232_v39 = vpop.permute.xlu0 %231 }
 0x2f1   :  { %341 = vmatmul.mubr.msk.bf16.vlgmr.msra.gmra.mrb[4].mxu1 %vm58_vm1, %v232_v39 }
 0x3c4   :  { %v282_v41 = vpop.f32.mrb[4].mxu1 }
 0x3c5   :  { %v283_v42 = vadd.f32 %v310_v40, %v282_v41  ;;  %v342_v43 = vpop.f32.mrb[5].mxu1 }
 0x3c6   :  { %v285_v44 = vpop.f32.mrb[6].mxu1 }
 0x3c7   :  { %288 = vst [vmem:[%s528_s7] sm:$0xff] %v283_v42  ;;  %v343_v45 = vpop.f32.mrb[7].mxu1 }
 0x3c8   :  { %301 = vsyncpa [#allocation4], 1 }
 0x3c9   :  { %302 = vsyncpa [#allocation6], 1 }

</bundles_post_ra>
